<compile_context>
chip_gen: v7x
topology: tpu7x:2x2x1
jax: 0.10.0
libtpu: 0.0.40
codegen_flags: <defaults>
</compile_context>

<pallas_src>
import jax
import jax.numpy as jnp
from jax.experimental import pallas as pl
from jax.experimental.pallas import tpu as pltpu


def _round_up(x, m):
    return ((x + m - 1) // m) * m


def decoder_kernel(z_ref, w1_ref, b1_ref, w2_ref, b2_ref, o_ref):
    # Linear 1 (bf16 MXU, f32 accumulate) + bias + ReLU.
    h = jnp.dot(z_ref[...], w1_ref[...], preferred_element_type=jnp.float32)
    h = jnp.maximum(h + b1_ref[...], 0.0)           # (T, H) + (1, H) broadcast
    # Linear 2 (bf16 MXU, f32 accumulate) + bias + Sigmoid.
    h = h.astype(w2_ref.dtype)                      # bf16 activations for MXU
    y = jnp.dot(h, w2_ref[...], preferred_element_type=jnp.float32)
    y = y + b2_ref[...]                             # (T, O) + (1, O) broadcast
    # sigmoid(y) = 1 / (1 + exp(-y)); exp and approx reciprocal both run on
    # the EUP slot, so the sigmoid is nearly free next to the HBM traffic.
    o_ref[...] = pl.reciprocal(1.0 + jnp.exp(-y), approx=True).astype(o_ref.dtype)


def decoder_forward(z, w1, b1, w2, b2, *, tile_b=1024, single_block_max=512):
    """z:(B,L) bf16, w1:(L,H) bf16, b1:(1,H) f32, w2:(H,O) bf16, b2:(1,O) f32."""
    B, latent = z.shape
    hidden = w1.shape[1]
    out = w2.shape[1]

    if B <= single_block_max:
        # Small-batch fast path: one block equal to the full arrays.
        # No padding, no post-call slice, grid of 1.
        tile = B
    else:
        # Tiled path: big tiles for HBM-roofline efficiency, but at least two
        # tiles so v7x megacore can split the batch across its 2 TensorCores.
        tile = min(tile_b, _round_up(pl.cdiv(B, 2), 16))

    b_pad = _round_up(B, tile)
    grid = (b_pad // tile,)

    # Pad the batch only when B is not a tile multiple (ragged last tile).
    z_in = z if b_pad == B else jnp.pad(z, ((0, b_pad - B), (0, 0)))

    bytes_accessed = (
        b_pad * latent * z.dtype.itemsize
        + w1.size * w1.dtype.itemsize
        + b1.size * b1.dtype.itemsize
        + w2.size * w2.dtype.itemsize
        + b2.size * b2.dtype.itemsize
        + b_pad * out * 4
    )
    cost = pl.CostEstimate(
        flops=2 * b_pad * (latent * hidden + hidden * out),
        transcendentals=2 * b_pad * out,            # exp + reciprocal
        bytes_accessed=bytes_accessed,
    )

    out_full = pl.pallas_call(
        decoder_kernel,
        out_shape=jax.ShapeDtypeStruct((b_pad, out), jnp.float32),
        grid_spec=pltpu.PrefetchScalarGridSpec(
            num_scalar_prefetch=0,
            grid=grid,
            in_specs=[
                pl.BlockSpec((tile, latent), lambda i: (i, 0)),    # Z tile
                pl.BlockSpec((latent, hidden), lambda i: (0, 0)),  # W1 (resident)
                pl.BlockSpec((1, hidden), lambda i: (0, 0)),       # b1 (resident)
                pl.BlockSpec((hidden, out), lambda i: (0, 0)),     # W2 (resident)
                pl.BlockSpec((1, out), lambda i: (0, 0)),          # b2 (resident)
            ],
            out_specs=pl.BlockSpec((tile, out), lambda i: (i, 0)),
        ),
        compiler_params=pltpu.CompilerParams(
            dimension_semantics=("parallel",),       # megacore split on v7x
            vmem_limit_bytes=32 * 1024 * 1024,
        ),
        cost_estimate=cost,
    )(z_in, w1, b1, w2, b2)

    # Only slice when the ragged last tile forced batch padding.
    return out_full if b_pad == B else out_full[:B]


def reference_forward(z, w1, b1, w2, b2):
    # Pure-JAX reference mirroring the kernel's bf16-storage / f32-accum numerics
    # (exact sigmoid; kernel uses an approximate EUP reciprocal).
    h = jnp.maximum(z.astype(jnp.float32) @ w1.astype(jnp.float32) + b1, 0.0)
    h = h.astype(jnp.bfloat16).astype(jnp.float32)
    y = h @ w2.astype(jnp.float32) + b2
    return jax.nn.sigmoid(y)


if __name__ == "__main__":
    LATENT, HIDDEN, OUT = 8, 32, 64

    key = jax.random.PRNGKey(0)
    k_z, k_w1, k_b1, k_w2, k_b2, k_z2 = jax.random.split(key, 6)

    # Deterministic synthetic params (no checkpoint load).
    w1 = (0.1 * jax.random.normal(k_w1, (LATENT, HIDDEN), jnp.float32)).astype(jnp.bfloat16)
    b1 = 0.1 * jax.random.normal(k_b1, (1, HIDDEN), jnp.float32)
    w2 = (0.1 * jax.random.normal(k_w2, (HIDDEN, OUT), jnp.float32)).astype(jnp.bfloat16)
    b2 = 0.1 * jax.random.normal(k_b2, (1, OUT), jnp.float32)

    # --- Small-batch fast path (B=2): single block, no pad, no slice. ---
    B = 2
    z = jax.random.normal(k_z, (B, LATENT), jnp.float32).astype(jnp.bfloat16)
    out = jax.block_until_ready(decoder_forward(z, w1, b1, w2, b2))
    ref = reference_forward(z, w1, b1, w2, b2)
    assert out.shape == (B, OUT)
    assert jnp.allclose(out, ref, atol=2e-3, rtol=2e-3), "small-batch mismatch"

    # --- Tiled path (B=640): 2 parallel batch tiles, still pad/slice-free. ---
    B2 = 640
    z2 = jax.random.normal(k_z2, (B2, LATENT), jnp.float32).astype(jnp.bfloat16)
    out2 = jax.block_until_ready(decoder_forward(z2, w1, b1, w2, b2))
    ref2 = reference_forward(z2, w1, b1, w2, b2)
    assert out2.shape == (B2, OUT)
    assert jnp.allclose(out2, ref2, atol=2e-3, rtol=2e-3), "tiled-path mismatch"

    print("KERNEL_OK")
</pallas_src>

<mosaic_0001>
module attributes {stable_mosaic.version = 11 : i64} {
  func.func @decoder_kernel(%arg0: i32, %arg1: memref<2x8xbf16, #tpu.memory_space<vmem>>, %arg2: memref<8x32xbf16, #tpu.memory_space<vmem>>, %arg3: memref<1x32xf32, #tpu.memory_space<vmem>>, %arg4: memref<32x64xbf16, #tpu.memory_space<vmem>>, %arg5: memref<1x64xf32, #tpu.memory_space<vmem>>, %arg6: memref<2x64xf32, #tpu.memory_space<vmem>>) attributes {dimension_semantics = [#tpu.dimension_semantics<parallel>], iteration_bounds = array<i64: 1>, scalar_prefetch = 0 : i64, scratch_operands = 0 : i64, tpu.core_type = #tpu.core_type<tc>, window_params = [{transform_indices = @transform_0, window_bounds = array<i64: 2, 8>}, {pipeline_mode = #tpu.pipeline_mode<synchronous>, transform_indices = @transform_1, window_bounds = array<i64: 8, 32>}, {pipeline_mode = #tpu.pipeline_mode<synchronous>, transform_indices = @transform_2, window_bounds = array<i64: 1, 32>}, {pipeline_mode = #tpu.pipeline_mode<synchronous>, transform_indices = @transform_3, window_bounds = array<i64: 32, 64>}, {pipeline_mode = #tpu.pipeline_mode<synchronous>, transform_indices = @transform_4, window_bounds = array<i64: 1, 64>}, {transform_indices = @transform_5, window_bounds = array<i64: 2, 64>}]} {
    %c0 = arith.constant 0 : index
    %c0_0 = arith.constant 0 : index
    %0 = vector.load %arg1[%c0, %c0_0] : memref<2x8xbf16, #tpu.memory_space<vmem>>, vector<2x8xbf16>
    %c0_1 = arith.constant 0 : index
    %c0_2 = arith.constant 0 : index
    %1 = vector.load %arg2[%c0_1, %c0_2] : memref<8x32xbf16, #tpu.memory_space<vmem>>, vector<8x32xbf16>
    %cst = arith.constant dense<0.000000e+00> : vector<2x32xf32>
    %2 = tpu.matmul %0, %1, %cst {dimension_numbers = #tpu.dot_dimension_numbers<[1], [0], [0], [1], [0, 0, 1, 1], [], []>} : vector<2x8xbf16>, vector<8x32xbf16>, vector<2x32xf32> -> vector<2x32xf32>
    %c0_3 = arith.constant 0 : index
    %c0_4 = arith.constant 0 : index
    %3 = vector.load %arg3[%c0_3, %c0_4] : memref<1x32xf32, #tpu.memory_space<vmem>>, vector<1x32xf32>
    %4 = vector.broadcast %3 : vector<1x32xf32> to vector<2x32xf32>
    %5 = arith.addf %2, %4 : vector<2x32xf32>
    %cst_5 = arith.constant 0.000000e+00 : f32
    %6 = vector.broadcast %cst_5 : f32 to vector<2x32xf32>
    %7 = arith.maximumf %5, %6 : vector<2x32xf32>
    %8 = arith.truncf %7 : vector<2x32xf32> to vector<2x32xbf16>
    %c0_6 = arith.constant 0 : index
    %c0_7 = arith.constant 0 : index
    %9 = vector.load %arg4[%c0_6, %c0_7] : memref<32x64xbf16, #tpu.memory_space<vmem>>, vector<32x64xbf16>
    %cst_8 = arith.constant dense<0.000000e+00> : vector<2x64xf32>
    %10 = tpu.matmul %8, %9, %cst_8 {dimension_numbers = #tpu.dot_dimension_numbers<[1], [0], [0], [1], [0, 0, 1, 1], [], []>} : vector<2x32xbf16>, vector<32x64xbf16>, vector<2x64xf32> -> vector<2x64xf32>
    %c0_9 = arith.constant 0 : index
    %c0_10 = arith.constant 0 : index
    %11 = vector.load %arg5[%c0_9, %c0_10] : memref<1x64xf32, #tpu.memory_space<vmem>>, vector<1x64xf32>
    %12 = vector.broadcast %11 : vector<1x64xf32> to vector<2x64xf32>
    %13 = arith.addf %10, %12 : vector<2x64xf32>
    %cst_11 = arith.constant 0.000000e+00 : f32
    %14 = vector.broadcast %cst_11 : f32 to vector<2x64xf32>
    %15 = arith.subf %14, %13 : vector<2x64xf32>
    %16 = math.exp %15 : vector<2x64xf32>
    %cst_12 = arith.constant 1.000000e+00 : f32
    %17 = vector.broadcast %cst_12 : f32 to vector<2x64xf32>
    %18 = arith.addf %17, %16 : vector<2x64xf32>
    %19 = tpu.reciprocal %18 {approx = true} : vector<2x64xf32> -> vector<2x64xf32>
    %c0_13 = arith.constant 0 : index
    %c0_14 = arith.constant 0 : index
    %20 = vector.load %arg6[%c0_13, %c0_14] : memref<2x64xf32, #tpu.memory_space<vmem>>, vector<2x64xf32>
    tpu.vector_store %arg6[%c0_13, %c0_14], %19 {strides = array<i32>} : memref<2x64xf32, #tpu.memory_space<vmem>>, vector<2x64xf32>,
    return
  }
  func.func @transform_0(%arg0: i32) -> (i32, i32) {
    %c0_i32 = arith.constant 0 : i32
    %c0_i32_0 = arith.constant 0 : i32
    return %arg0, %c0_i32 : i32, i32
  }
  func.func @transform_1(%arg0: i32) -> (i32, i32) {
    %c0_i32 = arith.constant 0 : i32
    %c0_i32_0 = arith.constant 0 : i32
    %c0_i32_1 = arith.constant 0 : i32
    return %c0_i32, %c0_i32_0 : i32, i32
  }
  func.func @transform_2(%arg0: i32) -> (i32, i32) {
    %c0_i32 = arith.constant 0 : i32
    %c0_i32_0 = arith.constant 0 : i32
    %c0_i32_1 = arith.constant 0 : i32
    return %c0_i32, %c0_i32_0 : i32, i32
  }
  func.func @transform_3(%arg0: i32) -> (i32, i32) {
    %c0_i32 = arith.constant 0 : i32
    %c0_i32_0 = arith.constant 0 : i32
    %c0_i32_1 = arith.constant 0 : i32
    return %c0_i32, %c0_i32_0 : i32, i32
  }
  func.func @transform_4(%arg0: i32) -> (i32, i32) {
    %c0_i32 = arith.constant 0 : i32
    %c0_i32_0 = arith.constant 0 : i32
    %c0_i32_1 = arith.constant 0 : i32
    return %c0_i32, %c0_i32_0 : i32, i32
  }
  func.func @transform_5(%arg0: i32) -> (i32, i32) {
    %c0_i32 = arith.constant 0 : i32
    %c0_i32_0 = arith.constant 0 : i32
    return %arg0, %c0_i32 : i32, i32
  }
}

</mosaic_0001>

<bundles_post_ra>
// kernel: tpu_custom_call.1
= control target key start
LH: loop header
LB: loop body
LE: loop exit
PB: predicated region body
PF: predicated region fallthrough
CT: control target
= control target key end

     0   :  { %10 = vsyncpa [#allocation3], 0  ;;  %s433_s0 = inlined_call_operand.hbm [shape: bf16[2,8], index: 0, kind: input, shape index: {}]   ;;  %s434_s1 = inlined_call_operand.hbm [shape: bf16[8,32], index: 1, kind: input, shape index: {}]   ;;  %s435_s2 = inlined_call_operand.vmem [shape: f32[1,32], index: 2, kind: input, shape index: {}]   ;;  %s436_s3 = inlined_call_operand.hbm [shape: bf16[32,64], index: 3, kind: input, shape index: {}]   ;;  %s437_s4 = inlined_call_operand.vmem [shape: f32[1,64], index: 4, kind: input, shape index: {}]   ;;  %s438_s5 = inlined_call_operand.hbm [shape: f32[2,64], index: 5, kind: output, shape index: {}]  }
   0x1   :  { %11 = vsyncpa [#allocation6], 0 }
   0x2   :  { %12 = vsyncpa [#allocation4], 0  ;;  %s341_s18 = smov [#allocation5]   ;;  %s342_s20 = smov [#allocation2]  }
   0x3   :  { %s29_s19 = sshll.u32 %s341_s18, 4  ;;  %s19_s21 = sshll.u32 %s342_s20, 4  ;;  %s30_s19 = int_to_ptr.vmem [resolvable:$true] %s29_s19  ;;  %s20_s21 = int_to_ptr.vmem [resolvable:$true] %s19_s21 }
   0x4   :  { %s247_s24 = scalar_lea.hbm %s434_s1, 64 }
   0x5   :  { %p248_p0 = scmp.ne.s32.totalorder %s434_s1, %s247_s24  ;;  %p251_p1 = scmp.lt.u32.totalorder %s247_s24, %s434_s1 }
   0x7   :  { %p253_p2 = pnand %p251_p1, %p248_p0 }
   0x9   :  { %256 = shalt.err (!%p253_p2)
}
   0xa   :  { %s257_s29 = scalar_lea.vmem %s30_s19, 64  ;;  %p262_p4 = scmp.lt.s32.totalorder %s30_s19, %s30_s19 }
   0xb   :  { %p258_p3 = scmp.ne.s32.totalorder %s30_s19, %s257_s29  ;;  %p263_p5 = scmp.lt.s32.totalorder %s257_s29, %s257_s29 }
   0xd   :  { %p264_p6 = por %p263_p5, %p262_p4 }
   0xf   :  { %p265_p7 = pnand %p264_p6, %p258_p3 }
  0x11   :  { %268 = shalt.err (!%p265_p7)
}
  0x12   :  { %32 = dma.hbm_to_vmem [thread:$0]  %s434_s1, 64, %s30_s19, [#allocation6]  }
  0x13   :  { %s269_s9 = scalar_lea.hbm %s433_s0, 16 }
  0x14   :  { %p270_p8 = scmp.ne.s32.totalorder %s433_s0, %s269_s9  ;;  %p273_p9 = scmp.lt.u32.totalorder %s269_s9, %s433_s0 }
  0x16   :  { %p275_p10 = pnand %p273_p9, %p270_p8 }
  0x18   :  { %278 = shalt.err (!%p275_p10)
}
  0x19   :  { %s279_s14 = scalar_lea.vmem %s20_s21, 16  ;;  %s283_s15 = scalar_lea.vmem %s20_s21, 32 }
  0x1a   :  { %p280_p11 = scmp.ne.s32.totalorder %s20_s21, %s279_s14  ;;  %p284_p12 = scmp.lt.s32.totalorder %s20_s21, %s20_s21 }
  0x1b   :  { %p285_p13 = scmp.lt.s32.totalorder %s283_s15, %s279_s14 }
  0x1d   :  { %p286_p0 = por %p285_p13, %p284_p12 }
  0x1f   :  { %p287_p1 = pnand %p286_p0, %p280_p11 }
  0x21   :  { %290 = shalt.err (!%p287_p1)
}
  0x22   :  { %22 = dma.hbm_to_vmem [thread:$0]  %s433_s0, 16, %s20_s21, [#allocation3]  }
  0x23   :  { %s343_s17 = smov [#allocation7]   ;;  %s291_s22 = scalar_lea.hbm %s436_s3, 256 }
  0x24   :  { %s40_s18 = sshll.u32 %s343_s17, 4  ;;  %p292_p2 = scmp.ne.s32.totalorder %s436_s3, %s291_s22  ;;  %s41_s18 = int_to_ptr.vmem [resolvable:$true] %s40_s18 }
  0x25   :  { %p295_p3 = scmp.lt.u32.totalorder %s291_s22, %s436_s3 }
  0x27   :  { %p297_p4 = pnand %p295_p3, %p292_p2 }
  0x29   :  { %300 = shalt.err (!%p297_p4)
}
  0x2a   :  { %s301_s27 = scalar_lea.vmem %s41_s18, 256  ;;  %p306_p6 = scmp.lt.s32.totalorder %s41_s18, %s41_s18 }
  0x2b   :  { %p302_p5 = scmp.ne.s32.totalorder %s41_s18, %s301_s27  ;;  %p307_p7 = scmp.lt.s32.totalorder %s301_s27, %s301_s27 }
  0x2d   :  { %p308_p8 = por %p307_p7, %p306_p6 }
  0x2f   :  { %p309_p9 = pnand %p308_p8, %p302_p5 }
  0x31   :  { %312 = shalt.err (!%p309_p9)
}
  0x32   :  { %s344_s0 = smov 64   ;;  %s345_s21 = smov 4  }
  0x33   :  { %46 = dma.hbm_to_vmem [thread:$0]  %s436_s3, 256, %s41_s18, [#allocation6], %s344_s0, %s344_s0, %s345_s21  }
  0x34   :  { %335 = dma.done.wait [#allocation3], 16  }
  0x35   :  { %336 = vsyncadd [#allocation3], 4294967280 }
  0x36   :  { %337 = dma.done.wait [#allocation6], 320  }
  0x37   :  { %338 = vsyncadd [#allocation6], 4294966976  ;;  %v346_v0 = vmov 0.0   ;;  %vm347_vm0 = vmmov 0   ;;  %vm72_vm1 = vcmask 1043456   ;;  %vm68_vm2 = vcmask 64512  }
  0x38   :  { %219 = vmatprep.subr.bf16.mxu0 %v346_v0  ;;  %221 = vmatprep.mubr.msk.bf16.mxu0 %vm347_vm0, %v346_v0  ;;  %v60_v1 = vld [vmem:[#allocation5] sm:$0xf]  ;;  %v59_v3 = vld [vmem:[#allocation2] sm:$0x1]  ;;  %v241_v4 = vld [vmem:[#allocation7] sm:$0xff]   ;;  %vm141_vm3 = vcmask 261120  }
  0x39   :  { %225 = vmatprep.subr.bf16.mxu1 %v346_v0  ;;  %229 = vmatprep.mubr.msk.bf16.mxu1 %vm347_vm0, %v346_v0  ;;  %v74_v2 = vsel %vm72_vm1, %v60_v1, 0  ;;  %v242_v5 = vld [vmem:[#allocation7 + $0x8] sm:$0xff]   ;;  %v208_v6 = vld [vmem:[%s435_s2] ss:$0 sm:$0xff]  ;;  %s348_s2 = smov [#allocation8]   ;;  %vm190_vm4 = vcmask 517120  }
  0x3a   :  { %220 = vmatpush3.bf16.msra.mxu0 %v74_v2  ;;  %226 = vmatpush3.bf16.msra.mxu1 %v241_v4  ;;  %v210_v14 = vld [vmem:[%s437_s4] ss:$0 sm:$0xff]  ;;  %s198_s8 = sshll.u32 %s348_s2, 4  ;;  %s199_s8 = int_to_ptr.vmem [resolvable:$true] %s198_s8 }
  0x3b   :  { %227 = vmatprep.subr.bf16.mxu1 %v346_v0  ;;  %s313_s9 = scalar_lea.vmem %s199_s8, 32  ;;  %p318_p11 = scmp.lt.s32.totalorder %s199_s8, %s199_s8 }
  0x3c   :  { %p314_p10 = scmp.ne.s32.totalorder %s199_s8, %s313_s9  ;;  %p319_p12 = scmp.lt.s32.totalorder %s313_s9, %s313_s9 }
  0x3d   :  { %222 = vmatmul.mubr.msk.bf16.vlgmr.msra.gmra.mrb[0].mxu0 %vm68_vm2, %v59_v3 }
  0x3e   :  { %228 = vmatpush3.bf16.msra.mxu1 %v242_v5  ;;  %p320_p13 = por %p319_p12, %p318_p11 }
  0x40   :  { %p321_p0 = pnand %p320_p13, %p314_p10 }
 0x110   :  { %v110_v7 = vpop.f32.mrb[0].mxu0 }
 0x111   :  { %v111_v8 = vadd.f32 %v208_v6, %v110_v7  ;;  %v223_v9 = vpop.f32.mrb[1].mxu0 }
 0x112   :  { %v113_v10 = vpop.f32.mrb[2].mxu0 }
 0x113   :  { %v116_v11 = vmax.f32 %v111_v8, 0.0  ;;  %v224_v12 = vpop.f32.mrb[3].mxu0 }
 0x115   :  { %v117_v13 = vpack.c.bf16 %v116_v11, %v116_v11 }
 0x117   :  { %230 = vmatmul.mubr.msk.bf16.vlgmr.msra.gmra.mrb[0].mxu1 %vm141_vm3, %v117_v13 }
 0x1ea   :  { %v179_v15 = vpop.f32.mrb[0].mxu1 }
 0x1eb   :  { %v180_v16 = vadd.f32 %v210_v14, %v179_v15  ;;  %v231_v17 = vpop.f32.mrb[1].mxu1 }
 0x1ec   :  { %v182_v18 = vpop.f32.mrb[2].mxu1 }
 0x1ed   :  { %v185_v19 = vsub.f32 0.0, %v180_v16  ;;  %v232_v20 = vpop.f32.mrb[3].mxu1 }
 0x1ef   :  { %v186_v21 = vmul.f32 1.442695, %v185_v19 }
 0x1f1   :  { %243 = vpow2.f32 %v186_v21 }
 0x1fb   :  { %v244_v22 = vpop.eup %243 }
 0x1fc   :  { %v188_v23 = vadd.f32 1.0, %v244_v22 }
 0x1fe   :  { %245 = vrcp.f32 %v188_v23 }
 0x208   :  { %v246_v24 = vpop.eup %245 }
 0x209   :  { %191 = vst.msk [vmem:[#allocation8] sm:$0x3] %vm190_vm4, %v246_v24 }
 0x20a   :  { %324 = shalt.err (!%p321_p0)
}
 0x20b   :  { %s325_s11 = scalar_lea.hbm %s438_s5, 32 }
 0x20c   :  { %p326_p1 = scmp.ne.s32.totalorder %s438_s5, %s325_s11  ;;  %p329_p2 = scmp.lt.u32.totalorder %s325_s11, %s438_s5 }
 0x20e   :  { %p331_p3 = pnand %p329_p2, %p326_p1 }
 0x210   :  { %334 = shalt.err (!%p331_p3)
}
 0x211   :  { %201 = dma.vmem_to_hbm [thread:$0]  %s199_s8, 32, %s438_s5, [#allocation4]  }
 0x212   :  { %339 = dma.done.wait [#allocation4], 32  }
 0x213   :  { %340 = vsyncadd [#allocation4], 4294967264 }
 0x214   :  { %205 = vsyncpa [#allocation3], 1 }
 0x215   :  { %206 = vsyncpa [#allocation6], 1 }
 0x216   :  { %207 = vsyncpa [#allocation4], 1 }

</bundles_post_ra>
